<compile_context>
chip_gen: v6e
topology: v6e:2x2x1
jax: 0.10.0
libtpu: 0.0.40
codegen_flags: <defaults>
</compile_context>

<pallas_src>
import jax
import jax.numpy as jnp
from jax.experimental import pallas as pl
from jax.experimental.pallas import tpu as pltpu


def mlp_kernel(x_ref, w1t_ref, b1_ref, w2t_ref, b2_ref, o_ref):
    # x_ref:  (tb, D) f32      w*t_ref: (D, D) bf16 (pre-transposed)
    # b*_ref: (1, D)  f32      o_ref:   (tb, D) out dtype
    x = x_ref[...].astype(jnp.bfloat16)          # cast on the VPU, not in HBM
    h = jnp.dot(x, w1t_ref[...], preferred_element_type=jnp.float32) + b1_ref[...]
    # NOTE: h is re-quantized to bf16 for the second MXU pass -> small,
    # documented precision loss vs the all-f32 PyTorch reference (ok at 1e-2).
    h = h.astype(jnp.bfloat16)
    y = jnp.dot(h, w2t_ref[...], preferred_element_type=jnp.float32) + b2_ref[...]
    o_ref[...] = y.astype(o_ref.dtype)


def prepare_mlp_params(w1, b1, w2, b2):
    """One-time weight prep, hoisted out of the per-call path.

    PyTorch nn.Linear stores W as (out_features, in_features); transpose to
    (in, out) and cast to bf16 once; keep biases f32 (added to the f32 acc).
    """
    d = w1.shape[0]
    return (jnp.asarray(w1.T, dtype=jnp.bfloat16),
            jnp.asarray(b1, dtype=jnp.float32).reshape(1, d),
            jnp.asarray(w2.T, dtype=jnp.bfloat16),
            jnp.asarray(b2, dtype=jnp.float32).reshape(1, d))


def _pick_batch_tile(B, block_b):
    """Largest multiple-of-8 divisor of B that is <= block_b, preferring >=2
    grid steps (feeds both v7x TensorCores) when that is legal. Falls back to
    the full batch (always a legal block) for small / oddly shaped B, so no
    divisibility assert can fire."""
    if B <= 8 or B % 8 != 0:
        return B
    target = min(block_b, B)
    if B // target < 2 and B >= 16:      # force >=2 grid steps when legal
        target = max(8, B // 2)
    tb = 8
    for cand in range(8, target + 1, 8):
        if B % cand == 0:
            tb = cand
    return tb


def mlp_forward(x, params, *, block_b=1024, out_dtype=None):
    """y = linear_2(linear_1(x)) fused into a single Pallas kernel.

    Pass out_dtype=jnp.bfloat16 if downstream consumers accept bf16 (halves
    the dominant output HBM stream); default matches the input dtype (f32),
    same as the PyTorch module.
    """
    w1t, b1_2d, w2t, b2_2d = params
    B, D = x.shape
    out_dtype = x.dtype if out_dtype is None else out_dtype

    tb = _pick_batch_tile(B, block_b)
    grid = (B // tb,)

    # Scoped-VMEM budget: double-buffered x/out tiles + resident weights, with
    # margin. Explicit so big batch tiles stay legal on v5e's 16 MiB default,
    # capped below v7x's 64 MiB physical VMEM.
    x_bytes = tb * D * jnp.dtype(x.dtype).itemsize
    o_bytes = tb * D * jnp.dtype(out_dtype).itemsize
    w_bytes = 2 * D * D * 2                       # two bf16 (D, D) weights
    est = 2 * (x_bytes + o_bytes) + 2 * w_bytes + 4 * D * 4
    vmem_limit = min(max(32 * 1024 * 1024, int(1.5 * est)), 60 * 1024 * 1024)

    # TODO(synk): for much larger D (>~2k), add pipeline_mode=pl.Buffered(1) on
    # the constant-index weight specs and/or an output-feature grid axis so the
    # resident weights don't blow VMEM; unnecessary at D=128 (~64 KiB resident).
    return pl.pallas_call(
        mlp_kernel,
        out_shape=jax.ShapeDtypeStruct((B, D), out_dtype),
        grid=grid,
        in_specs=[
            pl.BlockSpec((tb, D), lambda i: (i, 0)),  # x tile (per batch block)
            pl.BlockSpec((D, D), lambda i: (0, 0)),   # W1.T (VMEM resident)
            pl.BlockSpec((1, D), lambda i: (0, 0)),   # b1   (resident)
            pl.BlockSpec((D, D), lambda i: (0, 0)),   # W2.T (resident)
            pl.BlockSpec((1, D), lambda i: (0, 0)),   # b2   (resident)
        ],
        out_specs=pl.BlockSpec((tb, D), lambda i: (i, 0)),
        compiler_params=pltpu.CompilerParams(
            dimension_semantics=("parallel",),
            vmem_limit_bytes=vmem_limit),
    )(x, w1t, b1_2d, w2t, b2_2d)


def test_mlp_forward(x, w1, b1, w2, b2, **kw):
    """Convenience wrapper matching the original (PyTorch-shaped) signature.
    Prefer prepare_mlp_params + mlp_forward so the transpose/cast is paid once."""
    return mlp_forward(x, prepare_mlp_params(w1, b1, w2, b2), **kw)


def reference_mlp(x, w1, b1, w2, b2):
    h = x @ w1.T + b1
    return h @ w2.T + b2


if __name__ == "__main__":
    B, D = 16, 128  # TestMLP(dim=128); B=16 -> two grid steps (exercises pipeline)
    key = jax.random.PRNGKey(0)
    kx, k1, k2, k3, k4 = jax.random.split(key, 5)

    x = jax.random.normal(kx, (B, D), dtype=jnp.float32)
    # deterministic synthetic params (PyTorch convention: W is (out, in))
    w1 = jax.random.normal(k1, (D, D), dtype=jnp.float32) * 0.02
    b1 = jax.random.normal(k2, (D,), dtype=jnp.float32) * 0.02
    w2 = jax.random.normal(k3, (D, D), dtype=jnp.float32) * 0.02
    b2 = jax.random.normal(k4, (D,), dtype=jnp.float32) * 0.02

    params = prepare_mlp_params(w1, b1, w2, b2)   # one-time weight prep
    out = mlp_forward(x, params)
    out = jax.block_until_ready(out)

    ref = reference_mlp(x, w1, b1, w2, b2)
    assert out.shape == (B, D)
    # bf16 MXU path (x, W, and inter-layer h quantized to bf16): loosened tol.
    assert jnp.allclose(out, ref, atol=1e-2, rtol=1e-2), "mismatch vs reference"

    print("KERNEL_OK")
</pallas_src>

<mosaic_0001>
module attributes {stable_mosaic.version = 11 : i64} {
  func.func @mlp_kernel(%arg0: i32, %arg1: memref<8x128xf32, #tpu.memory_space<vmem>>, %arg2: memref<128x128xbf16, #tpu.memory_space<vmem>>, %arg3: memref<1x128xf32, #tpu.memory_space<vmem>>, %arg4: memref<128x128xbf16, #tpu.memory_space<vmem>>, %arg5: memref<1x128xf32, #tpu.memory_space<vmem>>, %arg6: memref<8x128xf32, #tpu.memory_space<vmem>>) attributes {dimension_semantics = [#tpu.dimension_semantics<parallel>], iteration_bounds = array<i64: 2>, scalar_prefetch = 0 : i64, scratch_operands = 0 : i64, tpu.core_type = #tpu.core_type<tc>, window_params = [{transform_indices = @transform_0, window_bounds = array<i64: 8, 128>}, {pipeline_mode = #tpu.pipeline_mode<synchronous>, transform_indices = @transform_1, window_bounds = array<i64: 128, 128>}, {pipeline_mode = #tpu.pipeline_mode<synchronous>, transform_indices = @transform_2, window_bounds = array<i64: 1, 128>}, {pipeline_mode = #tpu.pipeline_mode<synchronous>, transform_indices = @transform_3, window_bounds = array<i64: 128, 128>}, {pipeline_mode = #tpu.pipeline_mode<synchronous>, transform_indices = @transform_4, window_bounds = array<i64: 1, 128>}, {transform_indices = @transform_5, window_bounds = array<i64: 8, 128>}]} {
    %c0 = arith.constant 0 : index
    %c0_0 = arith.constant 0 : index
    %0 = vector.load %arg1[%c0, %c0_0] : memref<8x128xf32, #tpu.memory_space<vmem>>, vector<8x128xf32>
    %1 = arith.truncf %0 : vector<8x128xf32> to vector<8x128xbf16>
    %c0_1 = arith.constant 0 : index
    %c0_2 = arith.constant 0 : index
    %2 = vector.load %arg2[%c0_1, %c0_2] : memref<128x128xbf16, #tpu.memory_space<vmem>>, vector<128x128xbf16>
    %cst = arith.constant dense<0.000000e+00> : vector<8x128xf32>
    %3 = tpu.matmul %1, %2, %cst {dimension_numbers = #tpu.dot_dimension_numbers<[1], [0], [0], [1], [0, 0, 1, 1], [], []>} : vector<8x128xbf16>, vector<128x128xbf16>, vector<8x128xf32> -> vector<8x128xf32>
    %c0_3 = arith.constant 0 : index
    %c0_4 = arith.constant 0 : index
    %4 = vector.load %arg3[%c0_3, %c0_4] : memref<1x128xf32, #tpu.memory_space<vmem>>, vector<1x128xf32>
    %5 = vector.broadcast %4 : vector<1x128xf32> to vector<8x128xf32>
    %6 = arith.addf %3, %5 : vector<8x128xf32>
    %7 = arith.truncf %6 : vector<8x128xf32> to vector<8x128xbf16>
    %c0_5 = arith.constant 0 : index
    %c0_6 = arith.constant 0 : index
    %8 = vector.load %arg4[%c0_5, %c0_6] : memref<128x128xbf16, #tpu.memory_space<vmem>>, vector<128x128xbf16>
    %cst_7 = arith.constant dense<0.000000e+00> : vector<8x128xf32>
    %9 = tpu.matmul %7, %8, %cst_7 {dimension_numbers = #tpu.dot_dimension_numbers<[1], [0], [0], [1], [0, 0, 1, 1], [], []>} : vector<8x128xbf16>, vector<128x128xbf16>, vector<8x128xf32> -> vector<8x128xf32>
    %c0_8 = arith.constant 0 : index
    %c0_9 = arith.constant 0 : index
    %10 = vector.load %arg5[%c0_8, %c0_9] : memref<1x128xf32, #tpu.memory_space<vmem>>, vector<1x128xf32>
    %11 = vector.broadcast %10 : vector<1x128xf32> to vector<8x128xf32>
    %12 = arith.addf %9, %11 : vector<8x128xf32>
    %c0_10 = arith.constant 0 : index
    %c0_11 = arith.constant 0 : index
    %13 = vector.load %arg6[%c0_10, %c0_11] : memref<8x128xf32, #tpu.memory_space<vmem>>, vector<8x128xf32>
    tpu.vector_store %arg6[%c0_10, %c0_11], %12 {strides = array<i32>} : memref<8x128xf32, #tpu.memory_space<vmem>>, vector<8x128xf32>,
    return
  }
  func.func @transform_0(%arg0: i32) -> (i32, i32) {
    %c0_i32 = arith.constant 0 : i32
    %c0_i32_0 = arith.constant 0 : i32
    return %arg0, %c0_i32 : i32, i32
  }
  func.func @transform_1(%arg0: i32) -> (i32, i32) {
    %c0_i32 = arith.constant 0 : i32
    %c0_i32_0 = arith.constant 0 : i32
    %c0_i32_1 = arith.constant 0 : i32
    return %c0_i32, %c0_i32_0 : i32, i32
  }
  func.func @transform_2(%arg0: i32) -> (i32, i32) {
    %c0_i32 = arith.constant 0 : i32
    %c0_i32_0 = arith.constant 0 : i32
    %c0_i32_1 = arith.constant 0 : i32
    return %c0_i32, %c0_i32_0 : i32, i32
  }
  func.func @transform_3(%arg0: i32) -> (i32, i32) {
    %c0_i32 = arith.constant 0 : i32
    %c0_i32_0 = arith.constant 0 : i32
    %c0_i32_1 = arith.constant 0 : i32
    return %c0_i32, %c0_i32_0 : i32, i32
  }
  func.func @transform_4(%arg0: i32) -> (i32, i32) {
    %c0_i32 = arith.constant 0 : i32
    %c0_i32_0 = arith.constant 0 : i32
    %c0_i32_1 = arith.constant 0 : i32
    return %c0_i32, %c0_i32_0 : i32, i32
  }
  func.func @transform_5(%arg0: i32) -> (i32, i32) {
    %c0_i32 = arith.constant 0 : i32
    %c0_i32_0 = arith.constant 0 : i32
    return %arg0, %c0_i32 : i32, i32
  }
}

</mosaic_0001>

<bundles_post_ra>
// kernel: tpu_custom_call.1
= control target key start
LH: loop header
LB: loop body
LE: loop exit
PB: predicated region body
PF: predicated region fallthrough
CT: control target
= control target key end

     0   :  { %10 = vsyncpa [#allocation3], 0  ;;  %s1156_s0 = inlined_call_operand.hbm [shape: f32[16,128], index: 0, kind: input, shape index: {}]   ;;  %s1157_s1 = inlined_call_operand.hbm [shape: bf16[128,128], index: 1, kind: input, shape index: {}]   ;;  %s1158_s2 = inlined_call_operand.vmem [shape: f32[1,128], index: 2, kind: input, shape index: {}]   ;;  %s1159_s3 = inlined_call_operand.hbm [shape: bf16[128,128], index: 3, kind: input, shape index: {}]   ;;  %s1160_s4 = inlined_call_operand.vmem [shape: f32[1,128], index: 4, kind: input, shape index: {}]   ;;  %s1161_s5 = inlined_call_operand.hbm [shape: f32[16,128], index: 5, kind: output, shape index: {}]  }
   0x1   :  { %12 = vsyncpa [#allocation3 + $0x1], 0 }
   0x2   :  { %13 = vsyncpa [#allocation6], 0 }
   0x3   :  { %14 = vsyncpa [#allocation4], 0 }
   0x4   :  { %16 = vsyncpa [#allocation4 + $0x1], 0  ;;  %s966_s18 = smov 0   ;;  %s968_s19 = smov 0  }
   0x5   :  { %s970_s20 = smov 0   ;;  %s972_s21 = smov 0  }
   0x6 LB: > { %s987_s22 = sadd.s32 4294967295, %s926_s21   ;;  %s599_s23 = sadd.s32 4294967294, %s926_s21   ;;  %s926_s21 = sphi %s972_s21, %s1183_s21   ;;  %s922_s20 = sphi %s970_s20, %s1182_s20   ;;  %s918_s19 = sphi %s968_s19, %s1181_s19   ;;  %s914_s18 = sphi %s966_s18, %s1180_s18  }
   0x7   : > { %p42_p0 = scmp.ne.s32.totalorder %s918_s19, %s914_s18  ;;  %p1162_p1 = scmp.eq.s32.totalorder %s987_s22, 0 }
   0x8   : > { %p156_p3 = scmp.eq.s32.totalorder %s599_s23, 1  ;;  %p600_p5 = scmp.ge.s32.totalorder %s926_s21, 1 }
   0x9   : > { %p996_p4 = por %p1162_p1, %p42_p0  ;;  %p163_p7 = scmp.lt.s32.totalorder %s926_s21, 3 }
   0xa   : > { %p1001_p6 = por %p156_p3, %p42_p0  ;;  %s928_s27 = smov [#allocation5]  }
   0xb   : > { %s1166_s24 = scalar_select %p996_p4, 1, 0 }
   0xc   : > { %s1167_s25 = scalar_select %p1001_p6, 1, 0 }
   0xd   : > { %p1006_p8 = pnand %p600_p5, %p163_p7  ;;  %s175_s28 = sshll.u32 %s928_s27, 4  ;;  %s176_s28 = int_to_ptr.vmem [resolvable:$true] %s175_s28 }
   0xe   : > { %s929_s30 = smov [#allocation7]   ;;  %s789_s7 = scalar_lea.vmem %s176_s28, 1024 }
   0xf   : > { %s1168_s26 = scalar_select %p1006_p8, 1, 0 }
  0x10   : > { %p703_p9 = pneg %p1006_p8  ;;  %s191_s6 = sshll.u32 %s929_s30, 4  ;;  %s192_s6 = int_to_ptr.vmem [resolvable:$true] %s191_s6 }
  0x11   : > { %p790_p13 = scmp.ne.s32.totalorder %s176_s28, %s789_s7  ;;  %p797_p5 = scmp.lt.s32.totalorder %s176_s28, %s176_s28 }
  0x12   : > { %p1015_p11 = pnand %p703_p9, %p1162_p1  ;;  %p798_p7 = scmp.lt.s32.totalorder %s789_s7, %s789_s7 }
  0x14   : > { %p780_p12 = pneg %p1015_p11  ;;  %p799_p10 = por %p798_p7, %p797_p5 }
  0x16   : > { %p792_p0 = pnand %p790_p13, %p780_p12 }
  0x18   : > { %p793_p3 = pneg %p792_p0 }
  0x1a   : > { %p800_p9 = pnand %p799_p10, %p793_p3 }
  0x1c   : > { %803 = shalt.err (!%p800_p9)
}
  0x1d   : > { %s930_s8 = smov 64   ;;  %s931_s9 = smov 4  }
  0x1e   : > { %706 = dma.hbm_to_vmem [thread:$0]  (!%p1015_p11), %s1157_s1, 1024, %s176_s28, [#allocation6], %s930_s8, %s930_s8, %s931_s9  }
  0x1f   : > { %s815_s12 = scalar_lea.vmem %s192_s6, 1024  ;;  %p823_p2 = scmp.lt.s32.totalorder %s192_s6, %s192_s6 }
  0x20   : > { %p816_p1 = scmp.ne.s32.totalorder %s192_s6, %s815_s12  ;;  %p824_p6 = scmp.lt.s32.totalorder %s815_s12, %s815_s12 }
  0x22   : > { %p818_p13 = pnand %p816_p1, %p780_p12  ;;  %p825_p5 = por %p824_p6, %p823_p2 }
  0x24   : > { %p819_p0 = pneg %p818_p13 }
  0x26   : > { %p826_p10 = pnand %p825_p5, %p819_p0 }
  0x28   : > { %829 = shalt.err (!%p826_p10)
}
  0x29   : > { %709 = dma.hbm_to_vmem [thread:$0]  (!%p1015_p11), %s1159_s3, 1024, %s192_s6, [#allocation6], %s930_s8, %s930_s8, %s931_s9  }
  0x2a   : > { %s1038_s15 = sadd.s32 1, %s926_s21   ;;  %s29_s16 = sadd.s32 1, %s922_s20 }
  0x2b   : > { %s26_s17 = ssub.s32 %s926_s21, %s1038_s15  ;;  %p36_p1 = scmp.ne.s32.totalorder %s922_s20, %s918_s19 }
  0x2c   : > { %p27_p2 = scmp.eq.s32.totalorder %s26_s17, 0  ;;  %p37_p6 = scmp.eq.s32.totalorder %s926_s21, 0 }
  0x2d   : > { %p1170_p12 = scmp.eq.s32.totalorder %s987_s22, 1  ;;  %p720_p7 = scmp.lt.s32.totalorder %s926_s21, 2 }
  0x2e   : > { %s1054_s27 = scalar_select %p27_p2, %s922_s20, %s29_s16  }
  0x2f   : > { %p1048_p3 = por %p1170_p12, %p36_p1  ;;  %p38_p9 = por %p37_p6, %p36_p1 }
  0x30   : > { %s208_s28 = sand.u32 1, %s922_s20   ;;  %s605_s30 = sshll.u32 %s926_s21, 7 }
  0x31   : > { %s1171_s23 = scalar_select %p1048_p3, 1, 0 }
  0x32   : > { %s604_s29 = sshll.u32 %s208_s28, 3  ;;  %s1061_s8 = scalar_lea.hbm %s1156_s0, %s605_s30 }
  0x33   : > { %s212_s9 = scalar_lea.vmem [#allocation2], %s604_s29  ;;  %p1063_p11 = pnand %p720_p7, %p38_p9 }
  0x34   : > { %s219_s10 = sshll.u32 %s212_s9, 4  ;;  %s209_s12 = scalar_lea.sflag [#allocation3], %s208_s28  ;;  %s220_s10 = int_to_ptr.vmem [resolvable:$true] %s219_s10 }
  0x35   : > { %s830_s13 = scalar_lea.hbm %s1061_s8, 128  ;;  %p832_p0 = pneg %p1063_p11 }
  0x36   : > { %p831_p13 = scmp.ne.s32.totalorder %s1061_s8, %s830_s13  ;;  %s835_s17 = scalar_lea.hbm %s1156_s0, 256 }
  0x37   : > { %p836_p1 = scmp.lt.s32.totalorder %s1061_s8, %s1156_s0  ;;  %p837_p2 = scmp.lt.s32.totalorder %s835_s17, %s830_s13 }
  0x38   : > { %p833_p5 = pnand %p832_p0, %p831_p13 }
  0x39   : > { %p838_p6 = por %p837_p2, %p836_p1 }
  0x3a   : > { %p834_p10 = pneg %p833_p5 }
  0x3c   : > { %p839_p12 = pnand %p838_p6, %p834_p10 }
  0x3e   : > { %842 = shalt.err (!%p839_p12)
}
  0x3f   : > { %s843_s6 = scalar_lea.vmem %s220_s10, 128  ;;  %s932_s28 = smov [#allocation2]  }
  0x40   : > { %p844_p7 = scmp.ne.s32.totalorder %s220_s10, %s843_s6  ;;  %s848_s7 = sshll.u32 %s932_s28, 4  ;;  %s849_s7 = int_to_ptr.vmem [resolvable:$false] %s848_s7 }
  0x41   : > { %s850_s9 = scalar_lea.vmem %s849_s7, 256  ;;  %p851_p13 = scmp.lt.s32.totalorder %s220_s10, %s849_s7 }
  0x42   : > { %p846_p9 = pnand %p844_p7, %p832_p0  ;;  %p852_p5 = scmp.lt.s32.totalorder %s850_s9, %s843_s6 }
  0x44   : > { %p847_p3 = pneg %p846_p9  ;;  %p853_p4 = por %p852_p5, %p851_p13 }
  0x46   : > { %p854_p8 = pnand %p853_p4, %p847_p3 }
  0x48   : > { %857 = shalt.err (!%p854_p8)
}
  0x49   : > { %713 = dma.hbm_to_vmem [thread:$0]  (!%p1063_p11), %s1061_s8, 128, %s220_s10, %s209_s12  }
  0x4a   : > { %p1173_p10 = scmp.ne.s32.totalorder %s1168_s26, 0 }
  0x4b   : > { %s1084_s13 = sand.u32 (!%p1173_p10), 1, %s918_s19   ;;  %p1174_p4 = scmp.ne.s32.totalorder (!%p1173_p10), %s1166_s24, 0 }
  0x4c   : > { %228 = sbr.rel (%p1173_p10) target bundleno = 525 (0x20d), region = 40  ;;  %s607_s14 = sshll.u32 (!%p1173_p10), %s1084_s13, 3 }
  0x4d   : > { %s231_s16 = scalar_lea.sflag (!%p1173_p10), [#allocation3], %s1084_s13  ;;  %s1090_s17 = scalar_lea.vmem (!%p1173_p10), [#allocation2], %s607_s14 }
  0x51   : > { %901 = dma.done.wait (%p1174_p4), %s231_s16, 128  }
  0x52   : > { %903 = vsyncadd (%p1174_p4), %s231_s16, 4294967168  ;;  %p1175_p8 = scmp.eq.s32.totalorder %s987_s22, 0 }
  0x54   : > { %905 = dma.done.wait (%p1175_p8), [#allocation6], 2048   ;;  %p1176_p3 = pmov %p1175_p8 }
  0x55   : > { %v933_v0 = vmov 0.0   ;;  %vm934_vm0 = vmmov 0   ;;  %v762_v1 = vld [vmem:[#allocation5 + $0x38] sm:$0xff]   ;;  %v763_v2 = vld [vmem:[#allocation5 + $0x30] sm:$0xff]   ;;  %v764_v3 = vld [vmem:[#allocation5 + $0x28] sm:$0xff]   ;;  %s630_s11 = sshll.u32 %s987_s22, 7 }
  0x56   : > { %907 = vsyncadd (%p1176_p3), [#allocation6], 4294965248  ;;  %651 = vmatprep.subr.bf16.mxu0 %v933_v0  ;;  %667 = vmatprep.mubr.msk.bf16.mxu0 %vm934_vm0, %v933_v0  ;;  %v770_v4 = vld [vmem:[#allocation7 + $0x38] sm:$0xff]   ;;  %v765_v5 = vld [vmem:[#allocation5 + $0x20] sm:$0xff]   ;;  %s268_s12 = scalar_lea.vmem [#allocation8], %s607_s14  ;;  %s1113_s28 = scalar_lea.hbm %s1161_s5, %s630_s11 }
  0x57   : > { %671 = vmatprep.subr.bf16.mxu1 %v933_v0  ;;  %687 = vmatprep.mubr.msk.bf16.mxu1 %vm934_vm0, %v933_v0  ;;  %v771_v6 = vld [vmem:[#allocation7 + $0x30] sm:$0xff]   ;;  %v766_v7 = vld [vmem:[#allocation5 + $0x18] sm:$0xff]   ;;  %v772_v8 = vld [vmem:[#allocation7 + $0x28] sm:$0xff]   ;;  %s510_s30 = sshll.u32 %s268_s12, 4  ;;  %s497_s7 = scalar_lea.sflag [#allocation4], %s1084_s13  ;;  %s1115_s30 = int_to_ptr.vmem [resolvable:$true] %s510_s30 }
  0x58   : > { %652 = vmatpush3.bf16.msra.mxu0 %v762_v1  ;;  %672 = vmatpush3.bf16.msra.mxu1 %v770_v4  ;;  %v767_v9 = vld [vmem:[#allocation5 + $0x10] sm:$0xff]   ;;  %v773_v10 = vld [vmem:[#allocation7 + $0x20] sm:$0xff]   ;;  %v768_v11 = vld [vmem:[#allocation5 + $0x8] sm:$0xff]   ;;  %s858_s22 = scalar_lea.vmem %s1115_s30, 128  ;;  %p1177_p0 = scmp.ne.s32.totalorder %s1171_s23, 0 }
  0x59   : > { %653 = vmatprep.subr.bf16.mxu0 %v933_v0  ;;  %673 = vmatprep.subr.bf16.mxu1 %v933_v0  ;;  %v774_v12 = vld [vmem:[#allocation7 + $0x18] sm:$0xff]   ;;  %v769_v13 = vld [vmem:[#allocation5] sm:$0xff]   ;;  %v775_v15 = vld [vmem:[#allocation7 + $0x10] sm:$0xff]   ;;  %p859_p11 = scmp.ne.s32.totalorder %s1115_s30, %s858_s22  ;;  %s935_s9 = smov [#allocation8]  }
  0x5a   : > { %v270_v14 = vld [vmem:[%s1090_s17] sm:$0xff]  ;;  %v776_v17 = vld [vmem:[#allocation7 + $0x8] sm:$0xff]   ;;  %v777_v18 = vld [vmem:[#allocation7] sm:$0xff]   ;;  %s862_s14 = sshll.u32 %s935_s9, 4  ;;  %s863_s14 = int_to_ptr.vmem [resolvable:$false] %s862_s14 }
  0x5b   : > { %v271_v16 = vpack.c.bf16 %v270_v14, %v270_v14  ;;  %v611_v19 = vld [vmem:[%s1158_s2] ss:$0 sm:$0xff]  ;;  %p860_p1 = pnand %p859_p11, %p1177_p0  ;;  %s864_s16 = scalar_lea.vmem %s863_s14, 256 }
  0x5c   : > { %654 = vmatpush3.bf16.msra.mxu0 %v763_v2  ;;  %674 = vmatpush3.bf16.msra.mxu1 %v771_v6  ;;  %v620_v26 = vld [vmem:[%s1160_s4] ss:$0 sm:$0xff]  ;;  %p865_p6 = scmp.lt.s32.totalorder %s1115_s30, %s863_s14  ;;  %p866_p12 = scmp.lt.s32.totalorder %s864_s16, %s858_s22 }
  0x5d   : > { %655 = vmatprep.subr.bf16.mxu0 %v933_v0  ;;  %675 = vmatprep.subr.bf16.mxu1 %v933_v0  ;;  %p861_p2 = pneg %p860_p1 }
  0x5e   : > { %p867_p7 = por %p866_p12, %p865_p6 }
  0x60   : > { %656 = vmatpush3.bf16.msra.mxu0 %v764_v3  ;;  %676 = vmatpush3.bf16.msra.mxu1 %v772_v8  ;;  %p868_p9 = pnand %p867_p7, %p861_p2 }
  0x61   : > { %657 = vmatprep.subr.bf16.mxu0 %v933_v0  ;;  %677 = vmatprep.subr.bf16.mxu1 %v933_v0 }
  0x64   : > { %658 = vmatpush3.bf16.msra.mxu0 %v765_v5  ;;  %678 = vmatpush3.bf16.msra.mxu1 %v773_v10 }
  0x65   : > { %659 = vmatprep.subr.bf16.mxu0 %v933_v0  ;;  %679 = vmatprep.subr.bf16.mxu1 %v933_v0 }
  0x68   : > { %660 = vmatpush3.bf16.msra.mxu0 %v766_v7  ;;  %680 = vmatpush3.bf16.msra.mxu1 %v774_v12 }
  0x69   : > { %661 = vmatprep.subr.bf16.mxu0 %v933_v0  ;;  %681 = vmatprep.subr.bf16.mxu1 %v933_v0 }
  0x6c   : > { %662 = vmatpush3.bf16.msra.mxu0 %v767_v9  ;;  %682 = vmatpush3.bf16.msra.mxu1 %v775_v15 }
  0x6d   : > { %663 = vmatprep.subr.bf16.mxu0 %v933_v0  ;;  %683 = vmatprep.subr.bf16.mxu1 %v933_v0 }
  0x70   : > { %664 = vmatpush3.bf16.msra.mxu0 %v768_v11  ;;  %684 = vmatpush3.bf16.msra.mxu1 %v776_v17 }
  0x71   : > { %665 = vmatprep.subr.bf16.mxu0 %v933_v0  ;;  %685 = vmatprep.subr.bf16.mxu1 %v933_v0 }
  0x74   : > { %666 = vmatpush3.bf16.msra.mxu0 %v769_v13  ;;  %686 = vmatpush3.bf16.msra.mxu1 %v777_v18 }
  0x77   : > { %668 = vmatmul.mubr.bf16.vlgmr.msra.gmra.mxu0 %v271_v16 }
 0x137   : > { %v377_v20 = vpop.f32.mrf.mxu0 }
 0x138   : > { %v378_v21 = vadd.f32 %v611_v19, %v377_v20 }
 0x139   : > { %v669_v22 = vpop.f32.mrf.mxu0 }
 0x13a   : > { %v383_v23 = vpack.c.bf16 %v378_v21, %v378_v21 }
 0x13b   : > { %v380_v24 = vpop.f32.mrf.mxu0 }
 0x13c   : > { %688 = vmatmul.mubr.bf16.vlgmr.msra.gmra.mxu1 %v383_v23 }
 0x13d   : > { %v670_v25 = vpop.f32.mrf.mxu0 }
 0x1fc   : > { %v489_v27 = vpop.f32.mrf.mxu1 }
 0x1fd   : > { %v490_v28 = vadd.f32 %v620_v26, %v489_v27 }
 0x1fe   : > { %v689_v29 = vpop.f32.mrf.mxu1 }
 0x1ff   : > { %495 = vst [vmem:[%s268_s12] sm:$0xff] %v490_v28 }
 0x200   : > { %v492_v30 = vpop.f32.mrf.mxu1 }
 0x201   : > { %871 = shalt.err (!%p868_p9)
}
 0x202   : > { %s872_s17 = scalar_lea.hbm %s1113_s28, 128  ;;  %s876_s26 = scalar_lea.hbm %s1161_s5, 256 }
 0x203   : > { %p873_p13 = scmp.ne.s32.totalorder %s1113_s28, %s872_s17  ;;  %p877_p4 = scmp.lt.s32.totalorder %s1113_s28, %s1161_s5 }
 0x204   : > { %p878_p8 = scmp.lt.s32.totalorder %s876_s26, %s872_s17 }
 0x205   : > { %p874_p5 = pnand %p873_p13, %p1177_p0 }
 0x206   : > { %p879_p3 = por %p878_p8, %p877_p4 }
 0x207   : > { %p875_p10 = pneg %p874_p5 }
 0x209   : > { %p880_p11 = pnand %p879_p3, %p875_p10 }
 0x20b   : > { %883 = shalt.err (!%p880_p11)
}
 0x20c   : > { %701 = dma.vmem_to_hbm [thread:$0]  (%p1177_p0), %s1115_s30, 128, %s1113_s28, %s497_s7   ;;  %v690_v31 = vpop.f32.mrf.mxu1 }
 0x20d PF: > { %s522_s11 = sand.u32 1, %s914_s18   ;;  %p1178_p1 = scmp.ne.s32.totalorder %s1167_s25, 0 }
 0x20e   : > { %p1179_p2 = scmp.ge.s32.totalorder %s926_s21, 2  ;;  %s523_s12 = scalar_lea.sflag [#allocation4], %s522_s11 }
 0x210   : > { %p715_p6 = pnand %p1179_p2, %p1178_p1 }
 0x212   : > { %p716_p12 = pneg %p715_p6 }
 0x214   : > { %909 = dma.done.wait (%p716_p12), %s523_s12, 128  }
 0x215   : > { %911 = vsyncadd (%p716_p12), %s523_s12, 4294967168  ;;  %p19_p7 = scmp.ge.s32.totalorder %s1038_s15, 4   ;;  %s1180_s18 = smov %s918_s19 }
 0x216   : > { %s1181_s19 = smov %s922_s20  ;;  %s1182_s20 = smov %s1054_s27 }
 0x217   : > { %s1183_s21 = smov %s1038_s15  ;;  %21 = sbr.rel (!%p19_p7) target bundleno = 6 (0x6), region = 93 }
 0x21c   :  { %528 = vsyncpa [#allocation3], 1 }
 0x21d   :  { %530 = vsyncpa [#allocation3 + $0x1], 1 }
 0x21e   :  { %531 = vsyncpa [#allocation6], 1 }
 0x21f   :  { %532 = vsyncpa [#allocation4], 1 }
 0x220   :  { %534 = vsyncpa [#allocation4 + $0x1], 1 }

</bundles_post_ra>
